<compile_context>
chip_gen: v7x
topology: tpu7x:2x2x1
jax: 0.10.0
libtpu: 0.0.40
codegen_flags: <defaults>
</compile_context>

<pallas_src>
import numpy as np
import jax
import jax.numpy as jnp
from jax.experimental import pallas as pl
from jax.experimental.pallas import tpu as pltpu


_LANE = 128   # lane width (last-dim native tile)


def _round_up(x, m):
    return ((x + m - 1) // m) * m


def _vmem_capacity_bytes():
    """Per-TensorCore VMEM capacity; conservative fallback if the query fails."""
    try:
        info = pltpu.get_tpu_info()
        cap = int(getattr(info, "vmem_capacity_bytes", 0))
        if cap > 0:
            return cap
    except Exception:
        pass
    return 64 * 1024 * 1024   # v7x per-core size: a safe lower bound everywhere


def _choose_batch_tile(B, row_bytes, avail_bytes, max_batch_tile):
    """Pick the batch tile TB (the MXU M dimension)."""
    if B <= 256:
        # Single block; the "full array dim" exception covers any B here and the
        # whole problem is tiny, so no tiling / partial blocks are needed.
        return B
    # 256-aligned tiles hit the native 2x256^2 systolic shape on v6e/v7x and are
    # still dense (2x128) on v5e; use 128 for mid-sized batches.
    align = 256 if B >= 512 else 128
    tb = min(max_batch_tile, B)
    if row_bytes > 0 and avail_bytes > 0:
        tb = min(tb, avail_bytes // row_bytes)
    tb = max((tb // align) * align, align)
    # Keep at least 2 grid steps so the "parallel" batch axis has work for both
    # TensorCores on v7x (and fewer wasted rows in the final partial block).
    half = max(_round_up((B + 1) // 2, align), align)
    return min(tb, half)


def mlp_kernel(x_ref, w1_ref, b1_ref, w2_ref, b2_ref, o_ref):
    # x arrives as f32; cast to bf16 on the VPU (free slot) right before the MXU.
    x_bf = x_ref[...].astype(w1_ref.dtype)
    # hidden = relu(x @ W1 + b1): bf16 operands on the MXU, f32 accumulation,
    # bias-add + ReLU in f32 on the VPU.
    h = jnp.dot(x_bf, w1_ref[...], preferred_element_type=jnp.float32)
    h = jnp.maximum(h + b1_ref[...], 0.0)
    # out = hidden @ W2 + b2 (hidden re-cast to bf16 for the MXU, f32 acc).
    o = jnp.dot(h.astype(w2_ref.dtype), w2_ref[...],
                preferred_element_type=jnp.float32)
    o_ref[...] = (o + b2_ref[...]).astype(o_ref.dtype)


def net_forward(x, w1, b1, w2, b2, *, compute_dtype=jnp.bfloat16,
                max_batch_tile=1024):
    """Forward pass of Net: relu(x @ w1 + b1) @ w2 + b2.

    x:  (B, F) float32
    w1: (F, H) float32   (torch stores (H, F); transpose before calling)
    b1: (H,)   float32
    w2: (H, O) float32
    b2: (O,)   float32
    """
    B, F = x.shape
    H = w1.shape[1]
    O = w2.shape[1]
    H_p = _round_up(H, _LANE)
    in_bytes = np.dtype(compute_dtype).itemsize

    # --- Weights: cast to bf16 and (only if needed) zero-pad along H. -------
    # These are small and DMA'd once; x and the output are never padded.
    w1_p = w1.astype(compute_dtype)
    w2_p = w2.astype(compute_dtype)
    b1_p = b1.astype(jnp.float32).reshape(1, H)
    b2_p = b2.astype(jnp.float32).reshape(1, O)
    if H_p != H:
        w1_p = jnp.pad(w1_p, ((0, 0), (0, H_p - H)))
        w2_p = jnp.pad(w2_p, ((0, H_p - H), (0, 0)))
        b1_p = jnp.pad(b1_p, ((0, 0), (0, H_p - H)))

    # --- VMEM-aware batch-tile selection (per-core, generation-aware). ------
    vmem_cap = _vmem_capacity_bytes()
    budget = int(vmem_cap * 0.70)
    # Pallas allocates 2 buffers per input even with a constant index_map, so
    # count the resident weights/biases twice.
    resident_bytes = 2 * ((F * H_p + H_p * O) * in_bytes + (H_p + O) * 4)
    # Per-batch-row VMEM bytes: double-buffered f32 x and out tiles, the bf16
    # copy of x, and the live hidden activation (f32 accumulator + bf16 copy).
    row_bytes = 2 * F * 4 + 2 * O * 4 + F * in_bytes + H_p * (4 + in_bytes)
    avail = max(budget - resident_bytes, 0)
    # NOTE: for very large F/H the resident weights themselves can exceed VMEM;
    # that would need an F/H reduction grid axis with a VMEM accumulator
    # (K-tiling), which this small-layer kernel does not implement.

    TB = _choose_batch_tile(B, row_bytes, avail, max_batch_tile)
    grid = (pl.cdiv(B, TB),)   # partial last block is clipped by Pallas

    out = pl.pallas_call(
        mlp_kernel,
        out_shape=jax.ShapeDtypeStruct((B, O), x.dtype),
        grid_spec=pltpu.PrefetchScalarGridSpec(
            num_scalar_prefetch=0,
            grid=grid,
            in_specs=[
                pl.BlockSpec((TB, F), lambda i: (i, 0)),    # streamed f32 x tiles
                pl.BlockSpec((F, H_p), lambda i: (0, 0)),   # resident W1 (bf16)
                pl.BlockSpec((1, H_p), lambda i: (0, 0)),   # resident b1 (f32)
                pl.BlockSpec((H_p, O), lambda i: (0, 0)),   # resident W2 (bf16)
                pl.BlockSpec((1, O), lambda i: (0, 0)),     # resident b2 (f32)
            ],
            out_specs=pl.BlockSpec((TB, O), lambda i: (i, 0)),
        ),
        compiler_params=pltpu.CompilerParams(
            dimension_semantics=("parallel",),              # batch rows independent
            vmem_limit_bytes=int(vmem_cap * 0.85),          # generation-aware
        ),
    )(x, w1_p, b1_p, w2_p, b2_p)

    return out   # exact (B, O): no padding was added, so no trailing slice


def net_reference_bf16(x, w1, b1, w2, b2):
    """Same math as the kernel (bf16 MXU operands, f32 accumulation)."""
    h = jnp.dot(x.astype(jnp.bfloat16), w1.astype(jnp.bfloat16),
                preferred_element_type=jnp.float32) + b1
    h = jnp.maximum(h, 0.0)
    return jnp.dot(h.astype(jnp.bfloat16), w2.astype(jnp.bfloat16),
                   preferred_element_type=jnp.float32) + b2


def net_reference_f32(x, w1, b1, w2, b2):
    h = jnp.maximum(x @ w1 + b1, 0.0)
    return h @ w2 + b2


if __name__ == "__main__":
    # Small shapes consistent with the module: Net(n_feature, n_hidden, n_output)
    batch, n_feature, n_hidden, n_output = 8, 16, 32, 8

    key = jax.random.PRNGKey(0)
    kx, kw1, kb1, kw2, kb2 = jax.random.split(key, 5)

    x = jax.random.normal(kx, (batch, n_feature), dtype=jnp.float32)

    # Deterministic parameter init (torch stores (out, in); we store (in, out)).
    w1 = jax.random.normal(kw1, (n_feature, n_hidden), dtype=jnp.float32) * 0.1
    b1 = jax.random.normal(kb1, (n_hidden,), dtype=jnp.float32) * 0.1
    w2 = jax.random.normal(kw2, (n_hidden, n_output), dtype=jnp.float32) * 0.1
    b2 = jax.random.normal(kb2, (n_output,), dtype=jnp.float32) * 0.1

    out = net_forward(x, w1, b1, w2, b2)
    jax.block_until_ready(out)

    assert out.shape == (batch, n_output)

    # Tight check against a reference using the same bf16-MXU / f32-accum path.
    ref_bf16 = net_reference_bf16(x, w1, b1, w2, b2)
    assert jnp.allclose(out, ref_bf16, atol=1e-3, rtol=1e-3)

    # Loose check against the pure-f32 PyTorch-equivalent forward.
    ref_f32 = net_reference_f32(x, w1, b1, w2, b2)
    assert jnp.allclose(out, ref_f32, atol=2e-2, rtol=2e-2)

    print("KERNEL_OK")
</pallas_src>

<mosaic_0001>
module attributes {stable_mosaic.version = 11 : i64} {
  func.func @mlp_kernel(%arg0: i32, %arg1: memref<8x16xf32, #tpu.memory_space<vmem>>, %arg2: memref<16x128xbf16, #tpu.memory_space<vmem>>, %arg3: memref<1x128xf32, #tpu.memory_space<vmem>>, %arg4: memref<128x8xbf16, #tpu.memory_space<vmem>>, %arg5: memref<1x8xf32, #tpu.memory_space<vmem>>, %arg6: memref<8x8xf32, #tpu.memory_space<vmem>>) attributes {dimension_semantics = [#tpu.dimension_semantics<parallel>], iteration_bounds = array<i64: 1>, scalar_prefetch = 0 : i64, scratch_operands = 0 : i64, tpu.core_type = #tpu.core_type<tc>, window_params = [{transform_indices = @transform_0, window_bounds = array<i64: 8, 16>}, {pipeline_mode = #tpu.pipeline_mode<synchronous>, transform_indices = @transform_1, window_bounds = array<i64: 16, 128>}, {pipeline_mode = #tpu.pipeline_mode<synchronous>, transform_indices = @transform_2, window_bounds = array<i64: 1, 128>}, {pipeline_mode = #tpu.pipeline_mode<synchronous>, transform_indices = @transform_3, window_bounds = array<i64: 128, 8>}, {pipeline_mode = #tpu.pipeline_mode<synchronous>, transform_indices = @transform_4, window_bounds = array<i64: 1, 8>}, {transform_indices = @transform_5, window_bounds = array<i64: 8, 8>}]} {
    %c0 = arith.constant 0 : index
    %c0_0 = arith.constant 0 : index
    %0 = vector.load %arg1[%c0, %c0_0] : memref<8x16xf32, #tpu.memory_space<vmem>>, vector<8x16xf32>
    %1 = arith.truncf %0 : vector<8x16xf32> to vector<8x16xbf16>
    %c0_1 = arith.constant 0 : index
    %c0_2 = arith.constant 0 : index
    %2 = vector.load %arg2[%c0_1, %c0_2] : memref<16x128xbf16, #tpu.memory_space<vmem>>, vector<16x128xbf16>
    %cst = arith.constant dense<0.000000e+00> : vector<8x128xf32>
    %3 = tpu.matmul %1, %2, %cst {dimension_numbers = #tpu.dot_dimension_numbers<[1], [0], [0], [1], [0, 0, 1, 1], [], []>} : vector<8x16xbf16>, vector<16x128xbf16>, vector<8x128xf32> -> vector<8x128xf32>
    %c0_3 = arith.constant 0 : index
    %c0_4 = arith.constant 0 : index
    %4 = vector.load %arg3[%c0_3, %c0_4] : memref<1x128xf32, #tpu.memory_space<vmem>>, vector<1x128xf32>
    %5 = vector.broadcast %4 : vector<1x128xf32> to vector<8x128xf32>
    %6 = arith.addf %3, %5 : vector<8x128xf32>
    %cst_5 = arith.constant 0.000000e+00 : f32
    %7 = vector.broadcast %cst_5 : f32 to vector<8x128xf32>
    %8 = arith.maximumf %6, %7 : vector<8x128xf32>
    %9 = arith.truncf %8 : vector<8x128xf32> to vector<8x128xbf16>
    %c0_6 = arith.constant 0 : index
    %c0_7 = arith.constant 0 : index
    %10 = vector.load %arg4[%c0_6, %c0_7] : memref<128x8xbf16, #tpu.memory_space<vmem>>, vector<128x8xbf16>
    %cst_8 = arith.constant dense<0.000000e+00> : vector<8x8xf32>
    %11 = tpu.matmul %9, %10, %cst_8 {dimension_numbers = #tpu.dot_dimension_numbers<[1], [0], [0], [1], [0, 0, 1, 1], [], []>} : vector<8x128xbf16>, vector<128x8xbf16>, vector<8x8xf32> -> vector<8x8xf32>
    %c0_9 = arith.constant 0 : index
    %c0_10 = arith.constant 0 : index
    %12 = vector.load %arg5[%c0_9, %c0_10] : memref<1x8xf32, #tpu.memory_space<vmem>>, vector<1x8xf32>
    %13 = vector.broadcast %12 : vector<1x8xf32> to vector<8x8xf32>
    %14 = arith.addf %11, %13 : vector<8x8xf32>
    %c0_11 = arith.constant 0 : index
    %c0_12 = arith.constant 0 : index
    %15 = vector.load %arg6[%c0_11, %c0_12] : memref<8x8xf32, #tpu.memory_space<vmem>>, vector<8x8xf32>
    tpu.vector_store %arg6[%c0_11, %c0_12], %14 {strides = array<i32>} : memref<8x8xf32, #tpu.memory_space<vmem>>, vector<8x8xf32>,
    return
  }
  func.func @transform_0(%arg0: i32) -> (i32, i32) {
    %c0_i32 = arith.constant 0 : i32
    %c0_i32_0 = arith.constant 0 : i32
    return %arg0, %c0_i32 : i32, i32
  }
  func.func @transform_1(%arg0: i32) -> (i32, i32) {
    %c0_i32 = arith.constant 0 : i32
    %c0_i32_0 = arith.constant 0 : i32
    %c0_i32_1 = arith.constant 0 : i32
    return %c0_i32, %c0_i32_0 : i32, i32
  }
  func.func @transform_2(%arg0: i32) -> (i32, i32) {
    %c0_i32 = arith.constant 0 : i32
    %c0_i32_0 = arith.constant 0 : i32
    %c0_i32_1 = arith.constant 0 : i32
    return %c0_i32, %c0_i32_0 : i32, i32
  }
  func.func @transform_3(%arg0: i32) -> (i32, i32) {
    %c0_i32 = arith.constant 0 : i32
    %c0_i32_0 = arith.constant 0 : i32
    %c0_i32_1 = arith.constant 0 : i32
    return %c0_i32, %c0_i32_0 : i32, i32
  }
  func.func @transform_4(%arg0: i32) -> (i32, i32) {
    %c0_i32 = arith.constant 0 : i32
    %c0_i32_0 = arith.constant 0 : i32
    %c0_i32_1 = arith.constant 0 : i32
    return %c0_i32, %c0_i32_0 : i32, i32
  }
  func.func @transform_5(%arg0: i32) -> (i32, i32) {
    %c0_i32 = arith.constant 0 : i32
    %c0_i32_0 = arith.constant 0 : i32
    return %arg0, %c0_i32 : i32, i32
  }
}

</mosaic_0001>

<bundles_post_ra>
// kernel: tpu_custom_call.1
= control target key start
LH: loop header
LB: loop body
LE: loop exit
PB: predicated region body
PF: predicated region fallthrough
CT: control target
= control target key end

     0   :  { %v297_v1 = vmov 0.0   ;;  %vm39_vm0 = vcmask 130048   ;;  %vm298_vm1 = vmmov 0   ;;  %s378_s0 = inlined_call_operand.vmem [shape: f32[8,16], index: 0, kind: input, shape index: {}]   ;;  %s379_s1 = inlined_call_operand.vmem [shape: bf16[16,128], index: 1, kind: input, shape index: {}]   ;;  %s380_s2 = inlined_call_operand.vmem [shape: f32[1,128], index: 2, kind: input, shape index: {}]   ;;  %s381_s3 = inlined_call_operand.vmem [shape: bf16[128,8], index: 3, kind: input, shape index: {}]   ;;  %s382_s4 = inlined_call_operand.vmem [shape: f32[1,8], index: 4, kind: input, shape index: {}]   ;;  %s383_s5 = inlined_call_operand.hbm [shape: f32[8,8], index: 5, kind: output, shape index: {}]  }
   0x1   :  { %v264_v0 = vld [vmem:[%s379_s1] sm:$0xff]   ;;  %235 = vmatprep.subr.bf16.mxu0 %v297_v1  ;;  %241 = vmatprep.subr.bf16.mxu1 %v297_v1  ;;  %v266_v5 = vld [vmem:[%s381_s3 + $0x8] sm:$0xff]   ;;  %v267_v6 = vld [vmem:[%s381_s3 + $0x10] sm:$0xff]  }
   0x2   :  { %v22_v2 = vld [vmem:[%s378_s0] sm:$0xff]  ;;  %236 = vmatpush3.bf16.msra.mxu0 %v264_v0  ;;  %237 = vmatprep.mubr.msk.bf16.mxu0 %vm298_vm1, %v297_v1 }
   0x3   :  { %v265_v3 = vld [vmem:[%s381_s3] sm:$0xff]   ;;  %v23_v4 = vpack.c.bf16 %v22_v2, %v22_v2  ;;  %257 = vmatprep.mubr.msk.bf16.mxu1 %vm298_vm1, %v297_v1 }
   0x4   :  { %242 = vmatpush3.bf16.msra.mxu1 %v265_v3 }
   0x5   :  { %243 = vmatprep.subr.bf16.mxu1 %v297_v1  ;;  %238 = vmatmul.mubr.msk.bf16.vlgmr.msra.gmra.mrb[0].mxu0 %vm39_vm0, %v23_v4 }
   0x8   :  { %244 = vmatpush3.bf16.msra.mxu1 %v266_v5 }
   0x9   :  { %245 = vmatprep.subr.bf16.mxu1 %v297_v1 }
   0xa   :  { %10 = vsyncpa [#allocation3], 0  ;;  %v268_v7 = vld [vmem:[%s381_s3 + $0x18] sm:$0xff]   ;;  %v269_v8 = vld [vmem:[%s381_s3 + $0x20] sm:$0xff]   ;;  %s299_s15 = smov [#allocation2]   ;;  %vm196_vm2 = vcmask 64512  }
   0xb   :  { %v270_v9 = vld [vmem:[%s381_s3 + $0x28] sm:$0xff]   ;;  %v271_v10 = vld [vmem:[%s381_s3 + $0x30] sm:$0xff]   ;;  %v272_v11 = vld [vmem:[%s381_s3 + $0x38] sm:$0xff]   ;;  %s204_s16 = sshll.u32 %s299_s15, 4  ;;  %s205_s16 = int_to_ptr.vmem [resolvable:$true] %s204_s16 }
   0xc   :  { %246 = vmatpush3.bf16.msra.mxu1 %v267_v6  ;;  %v212_v12 = vld [vmem:[%s380_s2] ss:$0 sm:$0xff]  ;;  %s273_s2 = scalar_lea.vmem %s205_s16, 128  ;;  %p278_p1 = scmp.lt.s32.totalorder %s205_s16, %s205_s16 }
   0xd   :  { %247 = vmatprep.subr.bf16.mxu1 %v297_v1  ;;  %v215_v20 = vld [vmem:[%s382_s4] ss:$0 sm:$0xff]  ;;  %p274_p0 = scmp.ne.s32.totalorder %s205_s16, %s273_s2  ;;  %p279_p2 = scmp.lt.s32.totalorder %s273_s2, %s273_s2 }
   0xf   :  { %p280_p3 = por %p279_p2, %p278_p1 }
  0x10   :  { %248 = vmatpush3.bf16.msra.mxu1 %v268_v7 }
  0x11   :  { %249 = vmatprep.subr.bf16.mxu1 %v297_v1  ;;  %p281_p4 = pnand %p280_p3, %p274_p0 }
  0x14   :  { %250 = vmatpush3.bf16.msra.mxu1 %v269_v8 }
  0x15   :  { %251 = vmatprep.subr.bf16.mxu1 %v297_v1 }
  0x18   :  { %252 = vmatpush3.bf16.msra.mxu1 %v270_v9 }
  0x19   :  { %253 = vmatprep.subr.bf16.mxu1 %v297_v1 }
  0x1c   :  { %254 = vmatpush3.bf16.msra.mxu1 %v271_v10 }
  0x1d   :  { %255 = vmatprep.subr.bf16.mxu1 %v297_v1 }
  0x20   :  { %256 = vmatpush3.bf16.msra.mxu1 %v272_v11 }
  0xd8   :  { %v77_v13 = vpop.f32.mrb[0].mxu0 }
  0xd9   :  { %v78_v14 = vadd.f32 %v212_v12, %v77_v13  ;;  %v239_v15 = vpop.f32.mrb[1].mxu0 }
  0xda   :  { %v80_v16 = vpop.f32.mrb[2].mxu0 }
  0xdb   :  { %v83_v17 = vmax.f32 %v78_v14, 0.0  ;;  %v240_v18 = vpop.f32.mrb[3].mxu0 }
  0xdd   :  { %v84_v19 = vpack.c.bf16 %v83_v17, %v83_v17 }
  0xdf   :  { %258 = vmatmul.mubr.bf16.vlgmr.msra.gmra.mrb[0].mxu1 %v84_v19 }
 0x1b2   :  { %v190_v21 = vpop.f32.mrb[0].mxu1 }
 0x1b3   :  { %v191_v22 = vadd.f32 %v215_v20, %v190_v21  ;;  %v259_v23 = vpop.f32.mrb[1].mxu1 }
 0x1b4   :  { %v193_v24 = vpop.f32.mrb[2].mxu1 }
 0x1b5   :  { %v260_v25 = vpop.f32.mrb[3].mxu1  ;;  %197 = vst.msk [vmem:[#allocation2] sm:$0xff] %vm196_vm2, %v191_v22 }
 0x1b6   :  { %284 = shalt.err (!%p281_p4)
}
 0x1b7   :  { %s285_s4 = scalar_lea.hbm %s383_s5, 128 }
 0x1b8   :  { %p286_p5 = scmp.ne.s32.totalorder %s383_s5, %s285_s4  ;;  %p289_p6 = scmp.lt.u32.totalorder %s285_s4, %s383_s5 }
 0x1ba   :  { %p291_p7 = pnand %p289_p6, %p286_p5 }
 0x1bc   :  { %294 = shalt.err (!%p291_p7)
}
 0x1bd   :  { %207 = dma.vmem_to_hbm [thread:$0]  %s205_s16, 128, %s383_s5, [#allocation3]  }
 0x1be   :  { %295 = dma.done.wait [#allocation3], 128  }
 0x1bf   :  { %296 = vsyncadd [#allocation3], 4294967168 }
 0x1c0   :  { %211 = vsyncpa [#allocation3], 1 }

</bundles_post_ra>
